<compile_context>
chip_gen: v6e
topology: v6e:2x2x1
jax: 0.10.0
libtpu: 0.0.40
codegen_flags: <defaults>
</compile_context>

<pallas_src>
import functools

import jax
import jax.numpy as jnp
from jax.experimental import pallas as pl
from jax.experimental.pallas import tpu as pltpu


def _ls_ce_kernel(x_ref, tgt_ref, out_ref, *, smoothing, n_rows, tile_rows):
    """One row tile -> one scalar partial loss sum (no cross-step state)."""
    confidence = 1.0 - smoothing
    step = pl.program_id(0)

    x = x_ref[...].astype(jnp.float32)            # (TN, C) upcast in-vreg
    tgt = tgt_ref[...]                            # (TN, 1) int32
    tn, c = x.shape

    # Numerically-stable logsumexp per row (XLU reductions + EUP exp/log).
    m = jnp.max(x, axis=-1, keepdims=True)                            # (TN, 1)
    sexp = jnp.sum(jnp.exp(x - m), axis=-1, keepdims=True)            # (TN, 1)
    lse = m + jnp.log(sexp)                                           # (TN, 1)

    # Fused gather + mean: sum_c x * (confidence*onehot + smoothing/C).
    # (1, C) iota broadcast against the (TN, 1) targets -> no per-step (TN, C)
    # iota materialization.
    class_ids = jax.lax.broadcasted_iota(jnp.int32, (1, c), 1)        # (1, C)
    uniform_w = jnp.float32(smoothing / c)
    w = jnp.where(class_ids == tgt, jnp.float32(confidence) + uniform_w, uniform_w)
    wx = jnp.sum(x * w, axis=-1, keepdims=True)                       # (TN, 1)

    loss = lse - wx                                                   # (TN, 1)

    # Mask rows beyond the true batch size (ragged last tile). jnp.where lowers
    # to lax.select, so garbage/Inf in padded rows never reaches the sum.
    row_ids = step * tile_rows + jax.lax.broadcasted_iota(jnp.int32, (tn, 1), 0)
    loss = jnp.where(row_ids < n_rows, loss, 0.0)

    # Per-tile partial sum; final sum / N happens in the wrapper so the row
    # axis stays "parallel" with no resident accumulator.
    out_ref[...] = jnp.sum(loss, axis=0, keepdims=True).reshape(1, 1, 1)


def _round_up(v, m):
    return ((v + m - 1) // m) * m


def _choose_tile_rows(n, c, itemsize):
    # Per-row VMEM footprint of a tile:
    #   2 double-buffered native-dtype logits rows (BlockSpec pipelining)
    # + ~3 live f32 temporaries (upcast x, exp(x-m), x*w) during compute.
    # Budget ~36 MiB total so the kernel fits v7x's 64 MiB physical VMEM with
    # headroom; v5e/v6e (128 MiB) are comfortably inside.  Large tiles keep the
    # memory-bound f32 path near the HBM roofline and amortize the ~0.35 us
    # per-grid-step overhead.
    bytes_per_row = c * (2 * itemsize + 3 * 4)
    tn = (36 * 1024 * 1024) // max(1, bytes_per_row)
    tn = max(8, min(4096, (tn // 8) * 8))
    return min(tn, _round_up(n, 8))


def _vmem_limit_bytes():
    # Raise the scoped-VMEM ceiling above the 16-32 MiB defaults so large row
    # tiles fit, but never request more than ~3/4 of physical VMEM (v7x: 64 MiB
    # physical -> 48 MiB; v5e/v6e: 128 MiB physical -> capped at 96 MiB).
    try:
        cap = pltpu.get_tpu_info().vmem_capacity_bytes
    except Exception:  # pragma: no cover - conservative fallback
        cap = 128 * 1024 * 1024
    return int(min(96 * 1024 * 1024, max(32 * 1024 * 1024, (cap * 3) // 4)))


def label_smoothing_cross_entropy(x, target, smoothing=0.1, tile_rows=None):
    """x: (N, C) float logits (f32 or bf16); target: (N,) ints. Returns scalar."""
    n, c = x.shape
    if tile_rows is None:
        tile_rows = _choose_tile_rows(n, c, x.dtype.itemsize)
    tile_rows = max(8, _round_up(int(tile_rows), 8))
    num_tiles = pl.cdiv(n, tile_rows)

    tgt2d = target.astype(jnp.int32).reshape(n, 1)

    kernel = functools.partial(
        _ls_ce_kernel, smoothing=float(smoothing), n_rows=n, tile_rows=tile_rows)

    cost = pl.CostEstimate(
        flops=5 * n * c,
        transcendentals=n * c + n,
        bytes_accessed=n * c * x.dtype.itemsize + n * 4 + num_tiles * 4,
    )

    partials = pl.pallas_call(
        kernel,
        out_shape=jax.ShapeDtypeStruct((num_tiles, 1, 1), jnp.float32),
        grid=(num_tiles,),
        in_specs=[
            pl.BlockSpec((tile_rows, c), lambda i: (i, 0)),   # logits, native dtype
            pl.BlockSpec((tile_rows, 1), lambda i: (i, 0)),   # targets
        ],
        # One independent (1,1,1) partial per grid step -> axis can be parallel.
        out_specs=pl.BlockSpec((1, 1, 1), lambda i: (i, 0, 0)),
        compiler_params=pltpu.CompilerParams(
            dimension_semantics=("parallel",),
            vmem_limit_bytes=_vmem_limit_bytes(),
        ),
        cost_estimate=cost,
    )(x, tgt2d)

    # Tiny final reduction (num_tiles scalars) done by XLA outside the kernel.
    return jnp.sum(partials) / jnp.float32(n)


def _reference(x, target, smoothing=0.1):
    confidence = 1.0 - smoothing
    logprobs = jax.nn.log_softmax(x.astype(jnp.float32), axis=-1)
    nll = -jnp.take_along_axis(logprobs, target[:, None].astype(jnp.int32), axis=-1)[:, 0]
    smooth = -jnp.mean(logprobs, axis=-1)
    return jnp.mean(confidence * nll + smoothing * smooth)


if __name__ == "__main__":
    key = jax.random.PRNGKey(0)
    kx, kt = jax.random.split(key)

    N, C = 20, 16  # N not a multiple of the tile -> exercises ragged masking
    x = jax.random.normal(kx, (N, C), dtype=jnp.float32)
    target = jax.random.randint(kt, (N,), 0, C, dtype=jnp.int32)

    ref = _reference(x, target, smoothing=0.1)

    # Multi-tile grid (3 parallel steps, ragged last tile): partials + masking path.
    loss_tiled = jax.block_until_ready(
        label_smoothing_cross_entropy(x, target, smoothing=0.1, tile_rows=8))
    assert jnp.allclose(loss_tiled, ref, atol=1e-5, rtol=1e-5), (loss_tiled, ref)

    # Auto tile size (single tile here).
    loss_auto = jax.block_until_ready(
        label_smoothing_cross_entropy(x, target, smoothing=0.1))
    assert jnp.allclose(loss_auto, ref, atol=1e-5, rtol=1e-5), (loss_auto, ref)

    # bf16 logits stay bf16 on the HBM side; compute is f32 inside the kernel.
    xb = x.astype(jnp.bfloat16)
    loss_bf16 = jax.block_until_ready(
        label_smoothing_cross_entropy(xb, target, smoothing=0.1, tile_rows=8))
    ref_bf16 = _reference(xb, target, smoothing=0.1)
    assert jnp.allclose(loss_bf16, ref_bf16, atol=1e-4, rtol=1e-4), (loss_bf16, ref_bf16)

    print("KERNEL_OK")
</pallas_src>

<mosaic_0001>
module attributes {stable_mosaic.version = 11 : i64} {
  func.func @_ls_ce_kernel(%arg0: i32, %arg1: memref<8x16xf32, #tpu.memory_space<vmem>>, %arg2: memref<8x1xi32, #tpu.memory_space<vmem>>, %arg3: memref<1x1x1xf32, #tpu.memory_space<vmem>>) attributes {dimension_semantics = [#tpu.dimension_semantics<parallel>], iteration_bounds = array<i64: 3>, scalar_prefetch = 0 : i64, scratch_operands = 0 : i64, tpu.core_type = #tpu.core_type<tc>, window_params = [{transform_indices = @transform_0, window_bounds = array<i64: 8, 16>}, {transform_indices = @transform_1, window_bounds = array<i64: 8, 1>}, {transform_indices = @transform_2, window_bounds = array<i64: 1, 1, 1>}]} {
    %c0 = arith.constant 0 : index
    %c0_0 = arith.constant 0 : index
    %0 = vector.load %arg1[%c0, %c0_0] : memref<8x16xf32, #tpu.memory_space<vmem>>, vector<8x16xf32>
    %c0_1 = arith.constant 0 : index
    %c0_2 = arith.constant 0 : index
    %1 = vector.load %arg2[%c0_1, %c0_2] : memref<8x1xi32, #tpu.memory_space<vmem>>, vector<8x1xi32>
    %cst = arith.constant dense<0xFF800000> : vector<8xf32>
    %2 = vector.multi_reduction <maximumf>, %0, %cst [1] : vector<8x16xf32> to vector<8xf32>
    %3 = vector.shape_cast %2 : vector<8xf32> to vector<8x1xf32>
    %4 = vector.broadcast %3 : vector<8x1xf32> to vector<8x16xf32>
    %5 = arith.subf %0, %4 : vector<8x16xf32>
    %6 = math.exp %5 : vector<8x16xf32>
    %cst_3 = arith.constant dense<0.000000e+00> : vector<8xf32>
    %7 = vector.multi_reduction <add>, %6, %cst_3 [1] : vector<8x16xf32> to vector<8xf32>
    %8 = vector.shape_cast %7 : vector<8xf32> to vector<8x1xf32>
    %9 = math.log %8 : vector<8x1xf32>
    %10 = arith.addf %3, %9 : vector<8x1xf32>
    %11 = tpu.iota {dimensions = array<i32: 1>} : vector<1x16xi32>
    %12 = vector.broadcast %11 : vector<1x16xi32> to vector<8x16xi32>
    %13 = vector.broadcast %1 : vector<8x1xi32> to vector<8x16xi32>
    %14 = arith.cmpi eq, %12, %13 : vector<8x16xi32>
    %cst_4 = arith.constant 0.899999976 : f32
    %cst_5 = arith.constant 6.250000e-03 : f32
    %15 = arith.addf %cst_4, %cst_5 : f32
    %cst_6 = arith.constant 6.250000e-03 : f32
    %16 = vector.broadcast %15 : f32 to vector<8x16xf32>
    %17 = vector.broadcast %cst_6 : f32 to vector<8x16xf32>
    %18 = arith.select %14, %16, %17 : vector<8x16xi1>, vector<8x16xf32>
    %19 = arith.mulf %0, %18 : vector<8x16xf32>
    %cst_7 = arith.constant dense<0.000000e+00> : vector<8xf32>
    %20 = vector.multi_reduction <add>, %19, %cst_7 [1] : vector<8x16xf32> to vector<8xf32>
    %21 = vector.shape_cast %20 : vector<8xf32> to vector<8x1xf32>
    %22 = arith.subf %10, %21 : vector<8x1xf32>
    %c8_i32 = arith.constant 8 : i32
    %23 = arith.muli %arg0, %c8_i32 : i32
    %24 = tpu.iota {dimensions = array<i32: 0>} : vector<8x1xi32>
    %25 = vector.broadcast %23 : i32 to vector<8x1xi32>
    %26 = arith.addi %25, %24 : vector<8x1xi32>
    %c20_i32 = arith.constant 20 : i32
    %27 = vector.broadcast %c20_i32 : i32 to vector<8x1xi32>
    %28 = arith.cmpi slt, %26, %27 : vector<8x1xi32>
    %cst_8 = arith.constant 0.000000e+00 : f32
    %29 = vector.broadcast %cst_8 : f32 to vector<8x1xf32>
    %30 = arith.select %28, %22, %29 : vector<8x1xi1>, vector<8x1xf32>
    %cst_9 = arith.constant dense<0.000000e+00> : vector<1xf32>
    %31 = vector.multi_reduction <add>, %30, %cst_9 [0] : vector<8x1xf32> to vector<1xf32>
    %32 = vector.shape_cast %31 : vector<1xf32> to vector<1x1xf32>
    %33 = vector.shape_cast %32 : vector<1x1xf32> to vector<1x1x1xf32>
    %c0_10 = arith.constant 0 : index
    %c0_11 = arith.constant 0 : index
    %c0_12 = arith.constant 0 : index
    %34 = vector.load %arg3[%c0_10, %c0_11, %c0_12] : memref<1x1x1xf32, #tpu.memory_space<vmem>>, vector<1x1x1xf32>
    tpu.vector_store %arg3[%c0_10, %c0_11, %c0_12], %33 {strides = array<i32>} : memref<1x1x1xf32, #tpu.memory_space<vmem>>, vector<1x1x1xf32>,
    return
  }
  func.func @transform_0(%arg0: i32) -> (i32, i32) {
    %c0_i32 = arith.constant 0 : i32
    %c0_i32_0 = arith.constant 0 : i32
    return %arg0, %c0_i32 : i32, i32
  }
  func.func @transform_1(%arg0: i32) -> (i32, i32) {
    %c0_i32 = arith.constant 0 : i32
    %c0_i32_0 = arith.constant 0 : i32
    return %arg0, %c0_i32 : i32, i32
  }
  func.func @transform_2(%arg0: i32) -> (i32, i32, i32) {
    %c0_i32 = arith.constant 0 : i32
    %c0_i32_0 = arith.constant 0 : i32
    %c0_i32_1 = arith.constant 0 : i32
    return %arg0, %c0_i32, %c0_i32_0 : i32, i32, i32
  }
}

</mosaic_0001>

<bundles_post_ra>
// kernel: tpu_custom_call.1
= control target key start
LH: loop header
LB: loop body
LE: loop exit
PB: predicated region body
PF: predicated region fallthrough
CT: control target
= control target key end

     0   :  { %s305_s9 = smov 0   ;;  %s337_s0 = inlined_call_operand.vmem [shape: f32[20,16], index: 0, kind: input, shape index: {}]   ;;  %s338_s1 = inlined_call_operand.vmem [shape: s32[20,1], index: 1, kind: input, shape index: {}]   ;;  %s339_s2 = inlined_call_operand.vmem [shape: f32[3,1,1], index: 2, kind: output, shape index: {}]  }
   0x1 LB: > { %s311_s10 = sadd.s32 4294967295, %s286_s9   ;;  %p259_p0 = scmp.ge.s32.totalorder %s286_s9, 1  ;;  %s286_s9 = sphi %s305_s9, %s12_s9  }
   0x2   : > { %p120_p1 = scmp.lt.s32.totalorder %s286_s9, 4 }
   0x4   : > { %p121_p2 = pnand %p259_p0, %p120_p1 }
   0x5   : > { %p143_p3 = scmp.lt.s32.totalorder (!%p121_p2), %s311_s10, 2  ;;  %s262_s19 = sshll.u32 (!%p121_p2), %s311_s10, 3 }
   0x6   : > { %124 = sbr.rel (%p121_p2) target bundleno = 346 (0x15a), region = 28 }
   0xb   : > { %v288_v0 = vmov 0   ;;  %s317_s11 = scalar_select %p143_p3, %s311_s10, 2  ;;  %vm156_vm0 = vcmask 130048   ;;  %v169_v7 = vlaneseq  ;;  %v289_v10 = vmov 0.00625  }
   0xc   : > { %275 = vset.pattern.permute.xlu0 %v288_v0  ;;  %v184_v18 = vstv %s262_s19  ;;  %vm194_vm3 = vcmask 0  }
   0xd   : > { %s260_s12 = sshll.u32 %s317_s11, 3  ;;  %v170_v8 = vand.u32 127, %v169_v7  ;;  %v183_v17 = vshrl.u32 %v169_v7, 7  ;;  %s153_s22 = scalar_lea.vmem %s339_s2, %s317_s11 }
   0xe   : > { %s146_s15 = scalar_lea.vmem %s337_s0, %s260_s12  ;;  %s150_s18 = scalar_lea.vmem %s338_s1, %s260_s12 }
   0xf   : > { %v154_v1 = vld [vmem:[%s146_s15] sm:$0xff]  ;;  %v185_v20 = vadd.s32 %v184_v18, %v183_v17 }
  0x10   : > { %v157_v2 = vsel %vm156_vm0, %v154_v1, -inf  ;;  %v155_v3 = vld [vmem:[%s150_s18] sm:$0xff] }
  0x11   : > { %158 = vmax.xlane.f32.xlu0 %v157_v2  ;;  %vm186_vm2 = vcmp.lt.s32.totalorder %v185_v20, 20 }
  0x27   : > { %172 = vperm.xlu0 %275, %v155_v3  }
  0x9a   : > { %v159_v4 = vpop.xlane.xlu0 %158 }
  0x9b   : > { %v160_v5 = vsub.f32 %v154_v1, %v159_v4 }
  0x9d   : > { %v161_v6 = vmul.f32 1.442695, %v160_v5 }
  0x9f   : > { %276 = vpow2.f32 %v161_v6 }
  0xa2   : > { %v173_v9 = vpop.permute.xlu0 %172 }
  0xa3   : > { %vm174_vm1 = vcmp.eq.s32.totalorder %v170_v8, %v173_v9 }
  0xa4   : > { %v175_v11 = vsel %vm174_vm1, 0.90625, %v289_v10 }
  0xa5   : > { %v176_v12 = vmul.f32 %v175_v11, %v154_v1 }
  0xa7   : > { %v177_v15 = vsel %vm156_vm0, %v176_v12, 0.0 }
  0xac   : > { %v277_v13 = vpop.eup %276 }
  0xad   : > { %v163_v14 = vsel %vm156_vm0, %v277_v13, 0.0 }
  0xae   : > { %164 = vadd.xlane.f32.xlu1 %v163_v14 }
  0xb2   : > { %178 = vadd.xlane.f32.xlu1 %v177_v15 }
 0x137   : > { %v165_v16 = vpop.xlane.xlu1 %164 }
 0x138   : > { %278 = vlog2.f32 %v165_v16 }
 0x13b   : > { %v179_v22 = vpop.xlane.xlu1 %178 }
 0x145   : > { %v279_v19 = vpop.eup %278 }
 0x146   : > { %v167_v21 = vmul.f32 0.6931472, %v279_v19 }
 0x148   : > { %v168_v23 = vadd.f32 %v167_v21, %v159_v4 }
 0x14a   : > { %v180_v24 = vsub.f32 %v168_v23, %v179_v22 }
 0x14c   : > { %v187_v25 = vsel %vm186_vm2, %v180_v24, 0.0 }
 0x14d   : > { %v188_v26 = vrot.slane %v187_v25, 4 }
 0x14f   : > { %v189_v27 = vadd.f32 %v188_v26, %v187_v25 }
 0x151   : > { %v190_v28 = vrot.slane %v189_v27, 2 }
 0x153   : > { %v191_v29 = vadd.f32 %v190_v28, %v189_v27 }
 0x155   : > { %v192_v30 = vrot.slane %v191_v29, 1 }
 0x157   : > { %v193_v31 = vadd.f32 %v192_v30, %v191_v29 }
 0x159   : > { %195 = vst.msk [vmem:[%s153_s22] sm:$0x1] %vm194_vm3, %v193_v31 }
 0x15a PF: > { %s12_s9 = sadd.s32 1, %s286_s9  }
 0x15b   : > { %p9_p4 = scmp.ge.s32.totalorder %s12_s9, 5  }
 0x15d   :  { %11 = sbr.rel (!%p9_p4) target bundleno = 1 (0x1), region = 61 }

</bundles_post_ra>
